<compile_context>
chip_gen: v6e
topology: v6e:2x2x1
jax: 0.10.0
libtpu: 0.0.40
codegen_flags: <defaults>
</compile_context>

<pallas_src>
import jax
import jax.numpy as jnp
from jax import lax
from jax.experimental import pallas as pl
from jax.experimental.pallas import tpu as pltpu

LANES = 128
MAX_BLOCK_ROWS = 4096  # (4096, 128) f32 block = 2 MiB


def _cdiv(a, b):
    return -(-a // b)


def _round_up(a, m):
    return _cdiv(a, m) * m


def _sublane(dtype) -> int:
    # Minimum sublane multiple for a non-full block dim, by element width.
    return {4: 8, 2: 16, 1: 32}.get(jnp.dtype(dtype).itemsize, 8)


def _tensorcores_per_chip() -> int:
    """2 on dual-TensorCore chips (v7x / v5p / v4), else 1 (v5e / v6e / v2 / v3)."""
    try:
        kind = jax.devices()[0].device_kind.lower()
    except Exception:
        return 1
    if "lite" in kind or "v5e" in kind or "v6e" in kind or "v6" in kind:
        return 1
    if "v7" in kind or "v5p" in kind or "v4" in kind or "v5" in kind:
        return 2
    return 1


def _to_rows(x):
    """Flatten to (rows, 128).  Copy-free when x.size is a multiple of 128."""
    n = x.size
    rows = _cdiv(n, LANES)
    flat = x.reshape(-1)
    if rows * LANES != n:
        # Rare lane-tail pad (< 128 zero elements); zeros in both x and target
        # contribute 0 to the SSE and we divide by the true element count.
        flat = jnp.pad(flat, (0, rows * LANES - n))
    return flat.reshape(rows, LANES), rows


def _choose_tiling(rows, dtype, force_splits=None):
    """Return (splits, tile, steps, need_mask)."""
    sub = _sublane(dtype)
    if force_splits is not None:
        splits = max(1, int(force_splits))
    else:
        splits = 2 if (_tensorcores_per_chip() == 2 and rows >= 2 * sub) else 1
    tile = min(MAX_BLOCK_ROWS, _round_up(_cdiv(rows, splits), sub))
    steps = _cdiv(rows, splits * tile)
    need_mask = splits * steps * tile != rows
    return splits, tile, steps, need_mask


def _make_kernel(rows, tile, steps, need_mask):
    def kernel(x_ref, t_ref, part_ref):
        i = pl.program_id(1)

        @pl.when(i == 0)
        def _():
            part_ref[...] = jnp.zeros_like(part_ref)

        d = x_ref[...].astype(jnp.float32) - t_ref[...].astype(jnp.float32)
        d2 = d * d
        if need_mask:  # static: only emitted when the last block is partial
            c = pl.program_id(0)
            row0 = (c * steps + i) * tile
            row_ids = row0 + lax.broadcasted_iota(jnp.int32, (tile, LANES), 0)
            d2 = jnp.where(row_ids < rows, d2, 0.0)
        # Sublane reduce into the resident (1, 128) output block: per-step VMEM
        # RMW traffic is one vreg instead of the whole tile.
        part_ref[...] += jnp.sum(d2, axis=0, keepdims=True)

    return kernel


def _build_call(rows, tile, steps, splits, need_mask, dtype):
    kernel = _make_kernel(rows, tile, steps, need_mask)
    bytes_accessed = 2 * rows * LANES * jnp.dtype(dtype).itemsize
    return pl.pallas_call(
        kernel,
        out_shape=jax.ShapeDtypeStruct((splits, LANES), jnp.float32),
        grid_spec=pltpu.PrefetchScalarGridSpec(
            num_scalar_prefetch=0,
            grid=(splits, steps),
            in_specs=[
                pl.BlockSpec((tile, LANES), lambda c, i: (c * steps + i, 0)),
                pl.BlockSpec((tile, LANES), lambda c, i: (c * steps + i, 0)),
            ],
            # One resident (1, 128) lane-vector of partial sums per split.
            out_specs=pl.BlockSpec((1, LANES), lambda c, i: (c, 0)),
        ),
        compiler_params=pltpu.CompilerParams(
            dimension_semantics=("parallel", "arbitrary"),
            vmem_limit_bytes=32 * 1024 * 1024,
        ),
        cost_estimate=pl.CostEstimate(
            flops=3 * rows * LANES,
            transcendentals=0,
            bytes_accessed=bytes_accessed,
        ),
    )


def make_content_loss(target, *, force_splits=None):
    """ContentLoss(target): returns forward(x) -> (x, loss).

    Target preprocessing (flatten / optional lane pad) is done once here,
    mirroring the module storing `target` at construction time.
    """
    t2, rows = _to_rows(target)
    splits, tile, steps, need_mask = _choose_tiling(rows, target.dtype, force_splits)
    call = _build_call(rows, tile, steps, splits, need_mask, target.dtype)
    total_elems = float(target.size)

    def _forward(x):
        x2, _ = _to_rows(x)
        partials = call(x2, t2)                       # (splits, 128) f32
        loss = jnp.sum(partials) / jnp.float32(total_elems)
        # forward() returns the input unchanged; loss is the side output
        # (equivalent of the module storing self.loss).
        return x, loss

    forward = jax.jit(_forward)

    def forward_checked(x):
        assert x.shape == target.shape, "input/target shape mismatch"
        assert x.dtype == target.dtype, "input/target dtype mismatch"
        return forward(x)

    return forward_checked


def content_loss_forward(x, target):
    """One-shot convenience wrapper (re-preps target each call)."""
    return make_content_loss(target)(x)


def _check(shape, key, dtype=jnp.float32, tol=1e-5, force_splits=None):
    kx, kt = jax.random.split(key)
    x = jax.random.normal(kx, shape, dtype=dtype)
    target = jax.random.normal(kt, shape, dtype=dtype)
    forward = make_content_loss(target, force_splits=force_splits)
    out, loss = forward(x)
    jax.block_until_ready((out, loss))
    ref = jnp.mean((x.astype(jnp.float32) - target.astype(jnp.float32)) ** 2)
    assert jnp.allclose(loss, ref, rtol=tol, atol=tol), (shape, float(loss), float(ref))
    assert jnp.array_equal(out, x)


if __name__ == "__main__":
    key = jax.random.PRNGKey(0)
    k1, k2, k3, k4, k5 = jax.random.split(key, 5)

    # Primary case: NCHW batch=2, channels=4, spatial=16x16 (single block).
    _check((2, 4, 16, 16), k1)
    # Ragged element count (lane-tail pad path, zeros contribute 0 to SSE).
    _check((2, 3, 17, 19), k2)
    # Row count not a multiple of the tile -> in-kernel row-tail masking.
    _check((3, 5, 33, 65), k3)
    # Larger feature map: multi-step reduction with the resident accumulator.
    _check((1, 64, 128, 128), k4, force_splits=1)
    # Megacore-style 2-way split + multi-step + masked tail, forced so the
    # path is compile-tested on single-core chips too.
    _check((1, 64, 160, 160), k5, force_splits=2)

    print("KERNEL_OK")
</pallas_src>

<mosaic_0001>
module attributes {stable_mosaic.version = 11 : i64} {
  func.func @kernel(%arg0: i32, %arg1: i32, %arg2: memref<16x128xf32, #tpu.memory_space<vmem>>, %arg3: memref<16x128xf32, #tpu.memory_space<vmem>>, %arg4: memref<1x128xf32, #tpu.memory_space<vmem>>) attributes {dimension_semantics = [#tpu.dimension_semantics<parallel>, #tpu.dimension_semantics<arbitrary>], iteration_bounds = array<i64: 1, 1>, scalar_prefetch = 0 : i64, scratch_operands = 0 : i64, tpu.core_type = #tpu.core_type<tc>, window_params = [{transform_indices = @transform_0, window_bounds = array<i64: 16, 128>}, {transform_indices = @transform_1, window_bounds = array<i64: 16, 128>}, {transform_indices = @transform_2, window_bounds = array<i64: 1, 128>}]} {
    %c0_i32 = arith.constant 0 : i32
    %0 = arith.cmpi eq, %arg1, %c0_i32 : i32
    %1 = arith.extui %0 : i1 to i32
    %c0_i32_0 = arith.constant 0 : i32
    %2 = arith.cmpi ne, %1, %c0_i32_0 : i32
    scf.if %2 {
      %cst_8 = arith.constant 0.000000e+00 : f32
      %12 = vector.broadcast %cst_8 : f32 to vector<1x128xf32>
      %c0_9 = arith.constant 0 : index
      %c0_10 = arith.constant 0 : index
      %13 = vector.load %arg4[%c0_9, %c0_10] : memref<1x128xf32, #tpu.memory_space<vmem>>, vector<1x128xf32>
      tpu.vector_store %arg4[%c0_9, %c0_10], %12 {strides = array<i32>} : memref<1x128xf32, #tpu.memory_space<vmem>>, vector<1x128xf32>,
    } else {
    }
    %c0 = arith.constant 0 : index
    %c0_1 = arith.constant 0 : index
    %3 = vector.load %arg2[%c0, %c0_1] : memref<16x128xf32, #tpu.memory_space<vmem>>, vector<16x128xf32>
    %c0_2 = arith.constant 0 : index
    %c0_3 = arith.constant 0 : index
    %4 = vector.load %arg3[%c0_2, %c0_3] : memref<16x128xf32, #tpu.memory_space<vmem>>, vector<16x128xf32>
    %5 = arith.subf %3, %4 : vector<16x128xf32>
    %6 = arith.mulf %5, %5 : vector<16x128xf32>
    %c0_4 = arith.constant 0 : index
    %c0_5 = arith.constant 0 : index
    %7 = vector.load %arg4[%c0_4, %c0_5] : memref<1x128xf32, #tpu.memory_space<vmem>>, vector<1x128xf32>
    %cst = arith.constant dense<0.000000e+00> : vector<128xf32>
    %8 = vector.multi_reduction <add>, %6, %cst [0] : vector<16x128xf32> to vector<128xf32>
    %9 = vector.shape_cast %8 : vector<128xf32> to vector<1x128xf32>
    %10 = arith.addf %7, %9 : vector<1x128xf32>
    %c0_6 = arith.constant 0 : index
    %c0_7 = arith.constant 0 : index
    %11 = vector.load %arg4[%c0_6, %c0_7] : memref<1x128xf32, #tpu.memory_space<vmem>>, vector<1x128xf32>
    tpu.vector_store %arg4[%c0_6, %c0_7], %10 {strides = array<i32>} : memref<1x128xf32, #tpu.memory_space<vmem>>, vector<1x128xf32>,
    return
  }
  func.func @transform_0(%arg0: i32, %arg1: i32) -> (i32, i32) {
    %c1_i32 = arith.constant 1 : i32
    %0 = arith.muli %arg0, %c1_i32 : i32
    %1 = arith.addi %0, %arg1 : i32
    %c0_i32 = arith.constant 0 : i32
    %c0_i32_0 = arith.constant 0 : i32
    return %1, %c0_i32 : i32, i32
  }
  func.func @transform_1(%arg0: i32, %arg1: i32) -> (i32, i32) {
    %c1_i32 = arith.constant 1 : i32
    %0 = arith.muli %arg0, %c1_i32 : i32
    %1 = arith.addi %0, %arg1 : i32
    %c0_i32 = arith.constant 0 : i32
    %c0_i32_0 = arith.constant 0 : i32
    return %1, %c0_i32 : i32, i32
  }
  func.func @transform_2(%arg0: i32, %arg1: i32) -> (i32, i32) {
    %c0_i32 = arith.constant 0 : i32
    %c0_i32_0 = arith.constant 0 : i32
    return %arg0, %c0_i32 : i32, i32
  }
}

</mosaic_0001>

<bundles_post_ra>
// kernel: _forward.1
= control target key start
LH: loop header
LB: loop body
LE: loop exit
PB: predicated region body
PF: predicated region fallthrough
CT: control target
= control target key end

     0   :  { %v95_v0 = vmov 0.0   ;;  %s132_s2 = inlined_call_operand.vmem [shape: f32[1,128], index: 2, kind: output, shape index: {}]   ;;  %s133_s0 = inlined_call_operand.vmem [shape: f32[16,128], index: 0, kind: input, shape index: {}]   ;;  %s134_s1 = inlined_call_operand.vmem [shape: f32[16,128], index: 1, kind: input, shape index: {}]  }
   0x1   :  { %59 = vst [vmem:[%s132_s2] sm:$0x1] %v95_v0  ;;  %v60_v1 = vld [vmem:[%s133_s0] sm:$0xff]  ;;  %v61_v2 = vld [vmem:[%s133_s0 + $0x8] sm:$0xff] }
   0x2   :  { %v62_v3 = vld [vmem:[%s134_s1] sm:$0xff]  ;;  %v63_v4 = vld [vmem:[%s134_s1 + $0x8] sm:$0xff] }
   0x3   :  { %v64_v5 = vsub.f32 %v60_v1, %v62_v3  ;;  %v65_v6 = vsub.f32 %v61_v2, %v63_v4 }
   0x5   :  { %v66_v7 = vmul.f32 %v64_v5, %v64_v5  ;;  %v67_v8 = vmul.f32 %v65_v6, %v65_v6 }
   0x7   :  { %v69_v9 = vadd.f32 %v67_v8, %v66_v7 }
   0x8   :  { %v68_v15 = vld [vmem:[%s132_s2] sm:$0x1] }
   0x9   :  { %v70_v10 = vrot.slane %v69_v9, 4 }
   0xb   :  { %v71_v11 = vadd.f32 %v70_v10, %v69_v9 }
   0xd   :  { %v72_v12 = vrot.slane %v71_v11, 2 }
   0xf   :  { %v73_v13 = vadd.f32 %v72_v12, %v71_v11 }
  0x11   :  { %v74_v14 = vrot.slane %v73_v13, 1 }
  0x13   :  { %v75_v16 = vadd.f32 %v74_v14, %v73_v13 }
  0x15   :  { %v76_v17 = vadd.f32 %v75_v16, %v68_v15 }
  0x17   :  { %77 = vst [vmem:[%s132_s2] sm:$0x1] %v76_v17 }

</bundles_post_ra>
